<compile_context>
chip_gen: v7x
topology: tpu7x:2x2x1
jax: 0.10.0
libtpu: 0.0.40
codegen_flags: <defaults>
</compile_context>

<pallas_src>
import functools

import numpy as np
import jax
import jax.numpy as jnp
from jax.experimental import pallas as pl
from jax.experimental.pallas import tpu as pltpu


def simple_mlp_kernel(d_ref, y_ref, w_ref, o_ref, *, k, num_segments):
    y = y_ref[...]                                   # (Bp, N)  f32 flattened (padded) input
    w = w_ref[...]                                   # (N, Cp)  f32 masked, pre-transposed, lane-padded
    d = d_ref[...]                                   # (S, Bp, N) f32 dendritic activations

    # --- DendriticAbsoluteMaxGate1d ----------------------------------------
    # winning activation = segment with max |activation| (first index on ties),
    # gate: y * sigmoid(winning).  abs() done once on the whole buffer; the
    # segment reduction is a short where-chain on full (Bp, N) slabs (VPU only).
    abs_d = jnp.abs(d)
    winning = d[0]
    best_abs = abs_d[0]
    for s in range(1, num_segments):
        take = abs_d[s] > best_abs                   # strict '>' keeps first index on ties
        winning = jnp.where(take, d[s], winning)
        best_abs = jnp.where(take, abs_d[s], best_abs)
    gate = 0.5 * (jnp.tanh(0.5 * winning) + 1.0)     # sigmoid, single EUP push
    gated = y * gate

    # --- KWinners (k of N per row, ties broken by lower index like torch.topk)
    n = gated.shape[1]
    gj = gated[:, :, None]                           # candidate j
    gi = gated[:, None, :]                           # competitor i
    jo = jax.lax.broadcasted_iota(jnp.int32, (1, n, n), 1)
    io = jax.lax.broadcasted_iota(jnp.int32, (1, n, n), 2)
    beats = (gi > gj) | ((gi == gj) & (io < jo))     # competitor i outranks candidate j
    rank = jnp.sum(beats.astype(jnp.float32), axis=-1)   # (Bp, N), exact in f32 (<= 15)
    kw = jnp.where(rank < k, gated, 0.0)

    # --- SparseWeights(Linear(bias=False)): kw @ (W * mask).T ---------------
    # One MXU dot; zero-padded rows/lanes contribute zeros.
    o_ref[...] = jnp.dot(kw, w, preferred_element_type=jnp.float32)


def simple_mlp_forward(x, key, w_masked_t, k, num_segments,
                       *, b_pad=8, c_pad=128):
    b = x.shape[0]
    y = x.reshape(b, -1).astype(jnp.float32)         # flatten (wrapper glue)
    n = y.shape[1]
    c = w_masked_t.shape[-1]

    # Per-forward random dendritic activations, drawn once for the padded batch
    # (extra rows are never observed; their y rows are zero).
    d = jax.random.uniform(key, (num_segments, b_pad, n), dtype=jnp.float32)

    # Sublane/lane-dense padding: B -> 8 sublanes, C -> 128 lanes so the output
    # store is a whole unmasked vreg.
    y_p = jnp.zeros((b_pad, n), jnp.float32).at[:b].set(y)
    w_p = jnp.zeros((n, c_pad), jnp.float32).at[:, :c].set(w_masked_t)

    cost = pl.CostEstimate(
        flops=2 * b_pad * n * c_pad + 20 * num_segments * b_pad * n,
        transcendentals=b_pad * n,
        bytes_accessed=4 * (num_segments * b_pad * n + b_pad * n + n * c_pad + b_pad * c_pad),
    )

    out_p = pl.pallas_call(
        functools.partial(simple_mlp_kernel, k=k, num_segments=num_segments),
        grid=(1,),
        in_specs=[
            pl.BlockSpec((num_segments, b_pad, n), lambda i: (0, 0, 0)),
            pl.BlockSpec((b_pad, n), lambda i: (0, 0)),
            pl.BlockSpec((n, c_pad), lambda i: (0, 0)),
        ],
        out_specs=pl.BlockSpec((b_pad, c_pad), lambda i: (0, 0)),
        out_shape=jax.ShapeDtypeStruct((b_pad, c_pad), jnp.float32),
        compiler_params=pltpu.CompilerParams(
            dimension_semantics=("arbitrary",)),
        cost_estimate=cost,
    )(d, y_p, w_p)

    return out_p[:b, :c]


if __name__ == "__main__":
    key = jax.random.PRNGKey(0)
    k_x, k_w, k_m, k_d = jax.random.split(key, 4)

    num_classes = 10
    input_shape = (1, 4, 4)                  # prod = 16, must match KWinners(n=16)
    batch = 2
    in_features = int(np.prod(input_shape))  # 16
    num_segments = 10

    # input (layout: NCHW)
    x = jax.random.normal(k_x, (batch,) + input_shape, dtype=jnp.float32)

    # Linear(16, num_classes, bias=False) default init: U(-1/sqrt(fan_in), 1/sqrt(fan_in))
    bound = 1.0 / np.sqrt(in_features)
    w = jax.random.uniform(
        k_w, (num_classes, in_features), minval=-bound, maxval=bound,
        dtype=jnp.float32,
    )

    # SparseWeights(sparsity=0.5): fixed random mask zeroing 50% of incoming
    # weights per output unit (deterministic synthetic init, no checkpoint).
    n_zero = int(round(0.5 * in_features))
    scores = jax.random.uniform(k_m, (num_classes, in_features))
    thresh = jnp.sort(scores, axis=1)[:, n_zero - 1:n_zero]
    mask = (scores > thresh).astype(jnp.float32)     # 8 kept per row
    w_masked_t = (w * mask).T                        # (in_features, C)

    # KWinners(n=16, percent_on=0.75, k_inference_factor=1) -> k = 12.
    # Fresh module has zero duty cycles -> uniform boost -> ranking == plain top-k.
    # TODO(synk): duty-cycle update is training-time bookkeeping with no effect
    # on the forward output; not modeled.
    k_winners = int(round(in_features * 0.75))       # 12

    out = simple_mlp_forward(x, k_d, w_masked_t, k_winners, num_segments)
    jax.block_until_ready(out)
    assert out.shape == (batch, num_classes)
    print("KERNEL_OK")
</pallas_src>

<mosaic_0001>
module attributes {stable_mosaic.version = 11 : i64} {
  func.func @simple_mlp_kernel(%arg0: i32, %arg1: memref<10x8x16xf32, #tpu.memory_space<vmem>>, %arg2: memref<8x16xf32, #tpu.memory_space<vmem>>, %arg3: memref<16x128xf32, #tpu.memory_space<vmem>>, %arg4: memref<8x128xf32, #tpu.memory_space<vmem>>) attributes {dimension_semantics = [#tpu.dimension_semantics<arbitrary>], iteration_bounds = array<i64: 1>, scalar_prefetch = 0 : i64, scratch_operands = 0 : i64, tpu.core_type = #tpu.core_type<tc>, window_params = [{pipeline_mode = #tpu.pipeline_mode<synchronous>, transform_indices = @transform_0, window_bounds = array<i64: 10, 8, 16>}, {pipeline_mode = #tpu.pipeline_mode<synchronous>, transform_indices = @transform_1, window_bounds = array<i64: 8, 16>}, {pipeline_mode = #tpu.pipeline_mode<synchronous>, transform_indices = @transform_2, window_bounds = array<i64: 16, 128>}, {pipeline_mode = #tpu.pipeline_mode<synchronous>, transform_indices = @transform_3, window_bounds = array<i64: 8, 128>}]} {
    %c0 = arith.constant 0 : index
    %c0_0 = arith.constant 0 : index
    %0 = vector.load %arg2[%c0, %c0_0] : memref<8x16xf32, #tpu.memory_space<vmem>>, vector<8x16xf32>
    %c0_1 = arith.constant 0 : index
    %c0_2 = arith.constant 0 : index
    %1 = vector.load %arg3[%c0_1, %c0_2] : memref<16x128xf32, #tpu.memory_space<vmem>>, vector<16x128xf32>
    %c0_3 = arith.constant 0 : index
    %c0_4 = arith.constant 0 : index
    %c0_5 = arith.constant 0 : index
    %2 = vector.load %arg1[%c0_3, %c0_4, %c0_5] : memref<10x8x16xf32, #tpu.memory_space<vmem>>, vector<10x8x16xf32>
    %3 = math.absf %2 : vector<10x8x16xf32>
    %4 = vector.extract_strided_slice %2 {offsets = [0, 0, 0], sizes = [1, 8, 16], strides = [1, 1, 1]} : vector<10x8x16xf32> to vector<1x8x16xf32>
    %5 = vector.shape_cast %4 : vector<1x8x16xf32> to vector<8x16xf32>
    %6 = vector.extract_strided_slice %3 {offsets = [0, 0, 0], sizes = [1, 8, 16], strides = [1, 1, 1]} : vector<10x8x16xf32> to vector<1x8x16xf32>
    %7 = vector.shape_cast %6 : vector<1x8x16xf32> to vector<8x16xf32>
    %8 = vector.extract_strided_slice %3 {offsets = [1, 0, 0], sizes = [1, 8, 16], strides = [1, 1, 1]} : vector<10x8x16xf32> to vector<1x8x16xf32>
    %9 = vector.shape_cast %8 : vector<1x8x16xf32> to vector<8x16xf32>
    %10 = arith.cmpf ogt, %9, %7 : vector<8x16xf32>
    %11 = vector.extract_strided_slice %2 {offsets = [1, 0, 0], sizes = [1, 8, 16], strides = [1, 1, 1]} : vector<10x8x16xf32> to vector<1x8x16xf32>
    %12 = vector.shape_cast %11 : vector<1x8x16xf32> to vector<8x16xf32>
    %13 = arith.select %10, %12, %5 : vector<8x16xi1>, vector<8x16xf32>
    %14 = vector.extract_strided_slice %3 {offsets = [1, 0, 0], sizes = [1, 8, 16], strides = [1, 1, 1]} : vector<10x8x16xf32> to vector<1x8x16xf32>
    %15 = vector.shape_cast %14 : vector<1x8x16xf32> to vector<8x16xf32>
    %16 = arith.select %10, %15, %7 : vector<8x16xi1>, vector<8x16xf32>
    %17 = vector.extract_strided_slice %3 {offsets = [2, 0, 0], sizes = [1, 8, 16], strides = [1, 1, 1]} : vector<10x8x16xf32> to vector<1x8x16xf32>
    %18 = vector.shape_cast %17 : vector<1x8x16xf32> to vector<8x16xf32>
    %19 = arith.cmpf ogt, %18, %16 : vector<8x16xf32>
    %20 = vector.extract_strided_slice %2 {offsets = [2, 0, 0], sizes = [1, 8, 16], strides = [1, 1, 1]} : vector<10x8x16xf32> to vector<1x8x16xf32>
    %21 = vector.shape_cast %20 : vector<1x8x16xf32> to vector<8x16xf32>
    %22 = arith.select %19, %21, %13 : vector<8x16xi1>, vector<8x16xf32>
    %23 = vector.extract_strided_slice %3 {offsets = [2, 0, 0], sizes = [1, 8, 16], strides = [1, 1, 1]} : vector<10x8x16xf32> to vector<1x8x16xf32>
    %24 = vector.shape_cast %23 : vector<1x8x16xf32> to vector<8x16xf32>
    %25 = arith.select %19, %24, %16 : vector<8x16xi1>, vector<8x16xf32>
    %26 = vector.extract_strided_slice %3 {offsets = [3, 0, 0], sizes = [1, 8, 16], strides = [1, 1, 1]} : vector<10x8x16xf32> to vector<1x8x16xf32>
    %27 = vector.shape_cast %26 : vector<1x8x16xf32> to vector<8x16xf32>
    %28 = arith.cmpf ogt, %27, %25 : vector<8x16xf32>
    %29 = vector.extract_strided_slice %2 {offsets = [3, 0, 0], sizes = [1, 8, 16], strides = [1, 1, 1]} : vector<10x8x16xf32> to vector<1x8x16xf32>
    %30 = vector.shape_cast %29 : vector<1x8x16xf32> to vector<8x16xf32>
    %31 = arith.select %28, %30, %22 : vector<8x16xi1>, vector<8x16xf32>
    %32 = vector.extract_strided_slice %3 {offsets = [3, 0, 0], sizes = [1, 8, 16], strides = [1, 1, 1]} : vector<10x8x16xf32> to vector<1x8x16xf32>
    %33 = vector.shape_cast %32 : vector<1x8x16xf32> to vector<8x16xf32>
    %34 = arith.select %28, %33, %25 : vector<8x16xi1>, vector<8x16xf32>
    %35 = vector.extract_strided_slice %3 {offsets = [4, 0, 0], sizes = [1, 8, 16], strides = [1, 1, 1]} : vector<10x8x16xf32> to vector<1x8x16xf32>
    %36 = vector.shape_cast %35 : vector<1x8x16xf32> to vector<8x16xf32>
    %37 = arith.cmpf ogt, %36, %34 : vector<8x16xf32>
    %38 = vector.extract_strided_slice %2 {offsets = [4, 0, 0], sizes = [1, 8, 16], strides = [1, 1, 1]} : vector<10x8x16xf32> to vector<1x8x16xf32>
    %39 = vector.shape_cast %38 : vector<1x8x16xf32> to vector<8x16xf32>
    %40 = arith.select %37, %39, %31 : vector<8x16xi1>, vector<8x16xf32>
    %41 = vector.extract_strided_slice %3 {offsets = [4, 0, 0], sizes = [1, 8, 16], strides = [1, 1, 1]} : vector<10x8x16xf32> to vector<1x8x16xf32>
    %42 = vector.shape_cast %41 : vector<1x8x16xf32> to vector<8x16xf32>
    %43 = arith.select %37, %42, %34 : vector<8x16xi1>, vector<8x16xf32>
    %44 = vector.extract_strided_slice %3 {offsets = [5, 0, 0], sizes = [1, 8, 16], strides = [1, 1, 1]} : vector<10x8x16xf32> to vector<1x8x16xf32>
    %45 = vector.shape_cast %44 : vector<1x8x16xf32> to vector<8x16xf32>
    %46 = arith.cmpf ogt, %45, %43 : vector<8x16xf32>
    %47 = vector.extract_strided_slice %2 {offsets = [5, 0, 0], sizes = [1, 8, 16], strides = [1, 1, 1]} : vector<10x8x16xf32> to vector<1x8x16xf32>
    %48 = vector.shape_cast %47 : vector<1x8x16xf32> to vector<8x16xf32>
    %49 = arith.select %46, %48, %40 : vector<8x16xi1>, vector<8x16xf32>
    %50 = vector.extract_strided_slice %3 {offsets = [5, 0, 0], sizes = [1, 8, 16], strides = [1, 1, 1]} : vector<10x8x16xf32> to vector<1x8x16xf32>
    %51 = vector.shape_cast %50 : vector<1x8x16xf32> to vector<8x16xf32>
    %52 = arith.select %46, %51, %43 : vector<8x16xi1>, vector<8x16xf32>
    %53 = vector.extract_strided_slice %3 {offsets = [6, 0, 0], sizes = [1, 8, 16], strides = [1, 1, 1]} : vector<10x8x16xf32> to vector<1x8x16xf32>
    %54 = vector.shape_cast %53 : vector<1x8x16xf32> to vector<8x16xf32>
    %55 = arith.cmpf ogt, %54, %52 : vector<8x16xf32>
    %56 = vector.extract_strided_slice %2 {offsets = [6, 0, 0], sizes = [1, 8, 16], strides = [1, 1, 1]} : vector<10x8x16xf32> to vector<1x8x16xf32>
    %57 = vector.shape_cast %56 : vector<1x8x16xf32> to vector<8x16xf32>
    %58 = arith.select %55, %57, %49 : vector<8x16xi1>, vector<8x16xf32>
    %59 = vector.extract_strided_slice %3 {offsets = [6, 0, 0], sizes = [1, 8, 16], strides = [1, 1, 1]} : vector<10x8x16xf32> to vector<1x8x16xf32>
    %60 = vector.shape_cast %59 : vector<1x8x16xf32> to vector<8x16xf32>
    %61 = arith.select %55, %60, %52 : vector<8x16xi1>, vector<8x16xf32>
    %62 = vector.extract_strided_slice %3 {offsets = [7, 0, 0], sizes = [1, 8, 16], strides = [1, 1, 1]} : vector<10x8x16xf32> to vector<1x8x16xf32>
    %63 = vector.shape_cast %62 : vector<1x8x16xf32> to vector<8x16xf32>
    %64 = arith.cmpf ogt, %63, %61 : vector<8x16xf32>
    %65 = vector.extract_strided_slice %2 {offsets = [7, 0, 0], sizes = [1, 8, 16], strides = [1, 1, 1]} : vector<10x8x16xf32> to vector<1x8x16xf32>
    %66 = vector.shape_cast %65 : vector<1x8x16xf32> to vector<8x16xf32>
    %67 = arith.select %64, %66, %58 : vector<8x16xi1>, vector<8x16xf32>
    %68 = vector.extract_strided_slice %3 {offsets = [7, 0, 0], sizes = [1, 8, 16], strides = [1, 1, 1]} : vector<10x8x16xf32> to vector<1x8x16xf32>
    %69 = vector.shape_cast %68 : vector<1x8x16xf32> to vector<8x16xf32>
    %70 = arith.select %64, %69, %61 : vector<8x16xi1>, vector<8x16xf32>
    %71 = vector.extract_strided_slice %3 {offsets = [8, 0, 0], sizes = [1, 8, 16], strides = [1, 1, 1]} : vector<10x8x16xf32> to vector<1x8x16xf32>
    %72 = vector.shape_cast %71 : vector<1x8x16xf32> to vector<8x16xf32>
    %73 = arith.cmpf ogt, %72, %70 : vector<8x16xf32>
    %74 = vector.extract_strided_slice %2 {offsets = [8, 0, 0], sizes = [1, 8, 16], strides = [1, 1, 1]} : vector<10x8x16xf32> to vector<1x8x16xf32>
    %75 = vector.shape_cast %74 : vector<1x8x16xf32> to vector<8x16xf32>
    %76 = arith.select %73, %75, %67 : vector<8x16xi1>, vector<8x16xf32>
    %77 = vector.extract_strided_slice %3 {offsets = [8, 0, 0], sizes = [1, 8, 16], strides = [1, 1, 1]} : vector<10x8x16xf32> to vector<1x8x16xf32>
    %78 = vector.shape_cast %77 : vector<1x8x16xf32> to vector<8x16xf32>
    %79 = arith.select %73, %78, %70 : vector<8x16xi1>, vector<8x16xf32>
    %80 = vector.extract_strided_slice %3 {offsets = [9, 0, 0], sizes = [1, 8, 16], strides = [1, 1, 1]} : vector<10x8x16xf32> to vector<1x8x16xf32>
    %81 = vector.shape_cast %80 : vector<1x8x16xf32> to vector<8x16xf32>
    %82 = arith.cmpf ogt, %81, %79 : vector<8x16xf32>
    %83 = vector.extract_strided_slice %2 {offsets = [9, 0, 0], sizes = [1, 8, 16], strides = [1, 1, 1]} : vector<10x8x16xf32> to vector<1x8x16xf32>
    %84 = vector.shape_cast %83 : vector<1x8x16xf32> to vector<8x16xf32>
    %85 = arith.select %82, %84, %76 : vector<8x16xi1>, vector<8x16xf32>
    %cst = arith.constant 5.000000e-01 : f32
    %86 = vector.broadcast %cst : f32 to vector<8x16xf32>
    %87 = arith.mulf %86, %85 : vector<8x16xf32>
    %88 = math.tanh %87 : vector<8x16xf32>
    %cst_6 = arith.constant 1.000000e+00 : f32
    %89 = vector.broadcast %cst_6 : f32 to vector<8x16xf32>
    %90 = arith.addf %88, %89 : vector<8x16xf32>
    %cst_7 = arith.constant 5.000000e-01 : f32
    %91 = vector.broadcast %cst_7 : f32 to vector<8x16xf32>
    %92 = arith.mulf %91, %90 : vector<8x16xf32>
    %93 = arith.mulf %0, %92 : vector<8x16xf32>
    %94 = vector.shape_cast %93 : vector<8x16xf32> to vector<8x16x1xf32>
    %95 = vector.shape_cast %93 : vector<8x16xf32> to vector<8x1x16xf32>
    %96 = tpu.iota {dimensions = array<i32: 1>} : vector<1x16x16xi32>
    %97 = tpu.iota {dimensions = array<i32: 2>} : vector<1x16x16xi32>
    %98 = vector.broadcast %95 : vector<8x1x16xf32> to vector<8x16x16xf32>
    %99 = vector.broadcast %94 : vector<8x16x1xf32> to vector<8x16x16xf32>
    %100 = arith.cmpf ogt, %98, %99 : vector<8x16x16xf32>
    %101 = vector.broadcast %95 : vector<8x1x16xf32> to vector<8x16x16xf32>
    %102 = vector.broadcast %94 : vector<8x16x1xf32> to vector<8x16x16xf32>
    %103 = arith.cmpf oeq, %101, %102 : vector<8x16x16xf32>
    %104 = arith.cmpi slt, %97, %96 : vector<1x16x16xi32>
    %105 = vector.broadcast %104 : vector<1x16x16xi1> to vector<8x16x16xi1>
    %106 = arith.andi %103, %105 : vector<8x16x16xi1>
    %107 = arith.ori %100, %106 : vector<8x16x16xi1>
    %108 = arith.extui %107 : vector<8x16x16xi1> to vector<8x16x16xi32>
    %109 = arith.sitofp %108 : vector<8x16x16xi32> to vector<8x16x16xf32>
    %cst_8 = arith.constant dense<0.000000e+00> : vector<8x16xf32>
    %110 = vector.multi_reduction <add>, %109, %cst_8 [2] : vector<8x16x16xf32> to vector<8x16xf32>
    %cst_9 = arith.constant 1.200000e+01 : f32
    %111 = vector.broadcast %cst_9 : f32 to vector<8x16xf32>
    %112 = arith.cmpf olt, %110, %111 : vector<8x16xf32>
    %cst_10 = arith.constant 0.000000e+00 : f32
    %113 = vector.broadcast %cst_10 : f32 to vector<8x16xf32>
    %114 = arith.select %112, %93, %113 : vector<8x16xi1>, vector<8x16xf32>
    %cst_11 = arith.constant dense<0.000000e+00> : vector<8x128xf32>
    %115 = tpu.matmul %114, %1, %cst_11 {dimension_numbers = #tpu.dot_dimension_numbers<[1], [0], [0], [1], [0, 0, 1, 1], [], []>} : vector<8x16xf32>, vector<16x128xf32>, vector<8x128xf32> -> vector<8x128xf32>
    %c0_12 = arith.constant 0 : index
    %c0_13 = arith.constant 0 : index
    %116 = vector.load %arg4[%c0_12, %c0_13] : memref<8x128xf32, #tpu.memory_space<vmem>>, vector<8x128xf32>
    tpu.vector_store %arg4[%c0_12, %c0_13], %115 {strides = array<i32>} : memref<8x128xf32, #tpu.memory_space<vmem>>, vector<8x128xf32>,
    return
  }
  func.func @transform_0(%arg0: i32) -> (i32, i32, i32) {
    %c0_i32 = arith.constant 0 : i32
    %c0_i32_0 = arith.constant 0 : i32
    %c0_i32_1 = arith.constant 0 : i32
    %c0_i32_2 = arith.constant 0 : i32
    return %c0_i32, %c0_i32_0, %c0_i32_1 : i32, i32, i32
  }
  func.func @transform_1(%arg0: i32) -> (i32, i32) {
    %c0_i32 = arith.constant 0 : i32
    %c0_i32_0 = arith.constant 0 : i32
    %c0_i32_1 = arith.constant 0 : i32
    return %c0_i32, %c0_i32_0 : i32, i32
  }
  func.func @transform_2(%arg0: i32) -> (i32, i32) {
    %c0_i32 = arith.constant 0 : i32
    %c0_i32_0 = arith.constant 0 : i32
    %c0_i32_1 = arith.constant 0 : i32
    return %c0_i32, %c0_i32_0 : i32, i32
  }
  func.func @transform_3(%arg0: i32) -> (i32, i32) {
    %c0_i32 = arith.constant 0 : i32
    %c0_i32_0 = arith.constant 0 : i32
    %c0_i32_1 = arith.constant 0 : i32
    return %c0_i32, %c0_i32_0 : i32, i32
  }
}

</mosaic_0001>

<bundles_post_ra>
// kernel: tpu_custom_call.1
= control target key start
LH: loop header
LB: loop body
LE: loop exit
PB: predicated region body
PF: predicated region fallthrough
CT: control target
= control target key end

     0   :  { %8 = vsyncpa [#allocation3], 0  ;;  %s1205_s0 = inlined_call_operand.hbm [shape: f32[10,8,16], index: 0, kind: input, shape index: {}]   ;;  %s1206_s1 = inlined_call_operand.hbm [shape: f32[8,16], index: 1, kind: input, shape index: {}]   ;;  %s1207_s2 = inlined_call_operand.hbm [shape: f32[16,128], index: 2, kind: input, shape index: {}]   ;;  %s1208_s3 = inlined_call_operand.hbm [shape: f32[8,128], index: 3, kind: output, shape index: {}]  }
   0x1   :  { %9 = vsyncpa [#allocation6], 0 }
   0x2   :  { %10 = vsyncpa [#allocation4], 0  ;;  %s958_s12 = smov [#allocation5]   ;;  %s959_s14 = smov [#allocation2]  }
   0x3   :  { %s29_s13 = sshll.u32 %s958_s12, 4  ;;  %s16_s15 = sshll.u32 %s959_s14, 4  ;;  %s30_s13 = int_to_ptr.vmem [resolvable:$true] %s29_s13  ;;  %s989_s15 = int_to_ptr.vmem [resolvable:$true] %s16_s15 }
   0x4   :  { %s864_s18 = scalar_lea.hbm %s1206_s1, 128 }
   0x5   :  { %p865_p0 = scmp.ne.s32.totalorder %s1206_s1, %s864_s18  ;;  %p868_p1 = scmp.lt.u32.totalorder %s864_s18, %s1206_s1 }
   0x7   :  { %p870_p2 = pnand %p868_p1, %p865_p0 }
   0x9   :  { %873 = shalt.err (!%p870_p2)
}
   0xa   :  { %s874_s23 = scalar_lea.vmem %s30_s13, 128  ;;  %p879_p4 = scmp.lt.s32.totalorder %s30_s13, %s30_s13 }
   0xb   :  { %p875_p3 = scmp.ne.s32.totalorder %s30_s13, %s874_s23  ;;  %p880_p5 = scmp.lt.s32.totalorder %s874_s23, %s874_s23 }
   0xd   :  { %p881_p6 = por %p880_p5, %p879_p4 }
   0xf   :  { %p882_p7 = pnand %p881_p6, %p875_p3 }
  0x11   :  { %885 = shalt.err (!%p882_p7)
}
  0x12   :  { %32 = dma.hbm_to_vmem [thread:$0]  %s1206_s1, 128, %s30_s13, [#allocation6]  }
  0x13   :  { %s886_s28 = scalar_lea.hbm %s1205_s0, 1280 }
  0x14   :  { %p887_p8 = scmp.ne.s32.totalorder %s1205_s0, %s886_s28  ;;  %p890_p9 = scmp.lt.u32.totalorder %s886_s28, %s1205_s0 }
  0x16   :  { %p892_p10 = pnand %p890_p9, %p887_p8 }
  0x18   :  { %895 = shalt.err (!%p892_p10)
}
  0x19   :  { %s896_s6 = scalar_lea.vmem %s989_s15, 1280  ;;  %p901_p12 = scmp.lt.s32.totalorder %s989_s15, %s989_s15 }
  0x1a   :  { %p897_p11 = scmp.ne.s32.totalorder %s989_s15, %s896_s6  ;;  %p902_p13 = scmp.lt.s32.totalorder %s896_s6, %s896_s6 }
  0x1c   :  { %p903_p0 = por %p902_p13, %p901_p12 }
  0x1e   :  { %p904_p1 = pnand %p903_p0, %p897_p11 }
  0x20   :  { %907 = shalt.err (!%p904_p1)
}
  0x21   :  { %s960_s1 = smov 128   ;;  %s961_s7 = smov 8  }
  0x22   :  { %22 = dma.hbm_to_vmem [thread:$0]  %s1205_s0, 1280, %s989_s15, [#allocation3], %s960_s1, %s960_s1, %s961_s7  }
  0x23   :  { %s962_s10 = smov [#allocation7]   ;;  %s908_s14 = scalar_lea.hbm %s1207_s2, 256 }
  0x24   :  { %s38_s11 = sshll.u32 %s962_s10, 4  ;;  %p909_p2 = scmp.ne.s32.totalorder %s1207_s2, %s908_s14  ;;  %s39_s11 = int_to_ptr.vmem [resolvable:$true] %s38_s11 }
  0x25   :  { %p912_p3 = scmp.lt.u32.totalorder %s908_s14, %s1207_s2 }
  0x27   :  { %p914_p4 = pnand %p912_p3, %p909_p2 }
  0x29   :  { %917 = shalt.err (!%p914_p4)
}
  0x2a   :  { %s918_s20 = scalar_lea.vmem %s39_s11, 256  ;;  %p923_p6 = scmp.lt.s32.totalorder %s39_s11, %s39_s11 }
  0x2b   :  { %p919_p5 = scmp.ne.s32.totalorder %s39_s11, %s918_s20  ;;  %p924_p7 = scmp.lt.s32.totalorder %s918_s20, %s918_s20 }
  0x2d   :  { %p925_p8 = por %p924_p7, %p923_p6 }
  0x2f   :  { %p926_p9 = pnand %p925_p8, %p919_p5 }
  0x31   :  { %929 = shalt.err (!%p926_p9)
}
  0x32   :  { %44 = dma.hbm_to_vmem [thread:$0]  %s1207_s2, 256, %s39_s11, [#allocation6], %s960_s1, %s960_s1, %s961_s7  }
  0x33   :  { %952 = dma.done.wait [#allocation3], 1280  }
  0x34   :  { %953 = vsyncadd [#allocation3], 4294966016 }
  0x35   :  { %954 = dma.done.wait [#allocation6], 384  }
  0x36   :  { %955 = vsyncadd [#allocation6], 4294966912  ;;  %v57_v0 = vld [vmem:[#allocation2] sm:$0xff]  ;;  %v58_v1 = vld [vmem:[#allocation2 + $0x8] sm:$0xff]  ;;  %v108_v38 = vlaneseq  ;;  %v963_v39 = vmov 1966171168  }
  0x37   :  { %v59_v2 = vld [vmem:[#allocation2 + $0x10] sm:$0xff]  ;;  %v67_v3 = vand.u32 2147483647, %v57_v0  ;;  %v60_v4 = vld [vmem:[#allocation2 + $0x18] sm:$0xff]  ;;  %v68_v5 = vand.u32 2147483647, %v58_v1  ;;  %v199_v40 = vunpack.c.l.s4 %v963_v39 }
  0x38   :  { %v69_v6 = vand.u32 2147483647, %v59_v2  ;;  %v61_v7 = vld [vmem:[#allocation2 + $0x20] sm:$0xff]  ;;  %v70_v8 = vand.u32 2147483647, %v60_v4  ;;  %v62_v10 = vld [vmem:[#allocation2 + $0x28] sm:$0xff] }
  0x39   :  { %vm77_vm0 = vcmp.gt.f32.partialorder %v68_v5, %v67_v3  ;;  %v71_v12 = vand.u32 2147483647, %v61_v7  ;;  %v63_v13 = vld [vmem:[#allocation2 + $0x30] sm:$0xff]  ;;  %v72_v16 = vand.u32 2147483647, %v62_v10  ;;  %v64_v17 = vld [vmem:[#allocation2 + $0x38] sm:$0xff]  ;;  %v200_v44 = vunpack.c.0.s8 %v199_v40 }
  0x3a   :  { %v78_v9 = vsel %vm77_vm0, %v58_v1, %v57_v0  ;;  %v79_v11 = vsel %vm77_vm0, %v68_v5, %v67_v3  ;;  %v73_v20 = vand.u32 2147483647, %v63_v13  ;;  %v65_v21 = vld [vmem:[#allocation2 + $0x40] sm:$0xff]  ;;  %v74_v24 = vand.u32 2147483647, %v64_v17  ;;  %v66_v25 = vld [vmem:[#allocation2 + $0x48] sm:$0xff] }
  0x3b   :  { %vm80_vm1 = vcmp.gt.f32.partialorder %v69_v6, %v79_v11  ;;  %v75_v28 = vand.u32 2147483647, %v65_v21  ;;  %v76_v31 = vand.u32 2147483647, %v66_v25  ;;  %v1033_v41 = vshrl.u32 %v108_v38, 7  ;;  %v54_v45 = vld [vmem:[#allocation5] sm:$0xff] }
  0x3c   :  { %v81_v14 = vsel %vm80_vm1, %v59_v2, %v78_v9  ;;  %v82_v15 = vsel %vm80_vm1, %v69_v6, %v79_v11  ;;  %vm393_vm1 = vcmask 130048   ;;  %s968_s2 = smov [#allocation8]  }
  0x3d   :  { %vm83_vm2 = vcmp.gt.f32.partialorder %v70_v8, %v82_v15  ;;  %v110_v47 = vsub.s32 0, %v1033_v41  ;;  %v121_v48 = vsub.s32 1, %v1033_v41  ;;  %v203_v50 = vsub.s32 %v200_v44, %v1033_v41  ;;  %s809_s21 = sshll.u32 %s968_s2, 4  ;;  %s810_s21 = int_to_ptr.vmem [resolvable:$true] %s809_s21 }
  0x3e   :  { %v84_v18 = vsel %vm83_vm2, %v60_v4, %v81_v14  ;;  %v85_v19 = vsel %vm83_vm2, %v70_v8, %v82_v15  ;;  %v132_v53 = vsub.s32 2, %v1033_v41  ;;  %v143_v60 = vsub.s32 3, %v1033_v41  ;;  %s930_s22 = scalar_lea.vmem %s810_s21, 128  ;;  %p935_p11 = scmp.lt.s32.totalorder %s810_s21, %s810_s21 }
  0x3f   :  { %vm86_vm3 = vcmp.gt.f32.partialorder %v71_v12, %v85_v19  ;;  %v154_v8 = vsub.s32 4, %v1033_v41  ;;  %v165_v14 = vsub.s32 5, %v1033_v41  ;;  %p931_p10 = scmp.ne.s32.totalorder %s810_s21, %s930_s22  ;;  %p936_p12 = scmp.lt.s32.totalorder %s930_s22, %s930_s22 }
  0x40   :  { %v87_v22 = vsel %vm86_vm3, %v61_v7, %v84_v18  ;;  %v88_v23 = vsel %vm86_vm3, %v71_v12, %v85_v19  ;;  %v176_v18 = vsub.s32 6, %v1033_v41 }
  0x41   :  { %vm89_vm4 = vcmp.gt.f32.partialorder %v72_v16, %v88_v23  ;;  %p937_p13 = por %p936_p12, %p935_p11 }
  0x42   :  { %v90_v26 = vsel %vm89_vm4, %v62_v10, %v87_v22  ;;  %v91_v27 = vsel %vm89_vm4, %v72_v16, %v88_v23  ;;  %v1065_v22 = vand.u32 127, %v108_v38 }
  0x43   :  { %vm92_vm5 = vcmp.gt.f32.partialorder %v73_v20, %v91_v27  ;;  %p938_p0 = pnand %p937_p13, %p931_p10 }
  0x44   :  { %v93_v29 = vsel %vm92_vm5, %v63_v13, %v90_v26  ;;  %v94_v30 = vsel %vm92_vm5, %v73_v20, %v91_v27  ;;  %v187_v20 = vsub.s32 7, %v1033_v41  ;;  %vm1069_vm9 = vcmp.lt.s32.totalorder %v1065_v22, %v1033_v41 }
  0x45   :  { %vm95_vm6 = vcmp.gt.f32.partialorder %v74_v24, %v94_v30 }
  0x46   :  { %v96_v32 = vsel %vm95_vm6, %v64_v17, %v93_v29  ;;  %v97_v33 = vsel %vm95_vm6, %v74_v24, %v94_v30  ;;  %v248_v24 = vadd.s32 8, %v1033_v41  ;;  %v964_v30 = vmov 0.0  }
  0x47   :  { %vm98_vm7 = vcmp.gt.f32.partialorder %v75_v28, %v97_v33 }
  0x48   :  { %v99_v34 = vsel %vm98_vm7, %v65_v21, %v96_v32  ;;  %v100_v35 = vsel %vm98_vm7, %v75_v28, %v97_v33  ;;  %vm1083_vm0 = vcmp.lt.s32.totalorder %v1065_v22, %v248_v24 }
  0x49   :  { %vm101_vm8 = vcmp.gt.f32.partialorder %v76_v31, %v100_v35 }
  0x4a   :  { %v102_v36 = vsel %vm101_vm8, %v66_v25, %v99_v34 }
  0x4b   :  { %v103_v37 = vmul.f32 0.5, %v102_v36 }
  0x4d   :  { %862 = vtanh.f32 %v103_v37 }
  0x57   :  { %v863_v42 = vpop.eup %862 }
  0x58   :  { %v105_v43 = vadd.f32 1.0, %v863_v42 }
  0x5a   :  { %v106_v46 = vmul.f32 0.5, %v105_v43 }
  0x5c   :  { %v107_v49 = vmul.f32 %v106_v46, %v54_v45 }
  0x5e   :  { %v111_v51 = vrot.slane %v107_v49, %v110_v47  ;;  %v122_v52 = vrot.slane %v107_v49, %v121_v48  ;;  %v204_v54 = vrot.slane %v107_v49, %v203_v50  ;;  %v197_v55 = vcombine.high %v107_v49, %v107_v49 }
  0x5f   :  { %v133_v59 = vrot.slane %v107_v49, %v132_v53  ;;  %v144_v7 = vrot.slane %v107_v49, %v143_v60  ;;  %v155_v13 = vrot.slane %v107_v49, %v154_v8  ;;  %v166_v17 = vrot.slane %v107_v49, %v165_v14 }
  0x60   :  { %113 = vbcast.lane.b32.xlu0 %v111_v51, 256  ;;  %124 = vbcast.lane.b32.xlu1 %v122_v52, 256  ;;  %v220_v56 = vrot.slane %v204_v54, %v203_v50  ;;  %v212_v57 = vcombine.high %v204_v54, %v204_v54  ;;  %v211_v58 = vrot.slane %v197_v55, %v203_v50 }
  0x61   :  { %v177_v19 = vrot.slane %v107_v49, %v176_v18  ;;  %v1060_v21 = vrot.slane %v107_v49, %v187_v20 }
  0x62   :  { %v1040_v61 = vrot.slane %v220_v56, %v110_v47  ;;  %v234_v62 = vrot.slane %v212_v57, %v203_v50  ;;  %v242_v63 = vcombine.high %v220_v56, %v220_v56  ;;  %v227_v0 = vrot.slane %v211_v58, %v203_v50 }
  0x63   :  { %v213_v1 = vcombine.high %v211_v58, %v211_v58 }
  0x64   :  { %117 = vbcast.lane.b32.xlu0 %v111_v51, 264  ;;  %128 = vbcast.lane.b32.xlu1 %v122_v52, 264  ;;  %v1042_v2 = vrot.slane %v234_v62, %v110_v47  ;;  %v1044_v3 = vrot.slane %v242_v63, %v110_v47  ;;  %v244_v4 = vcombine.high %v234_v62, %v234_v62  ;;  %v965_v62 = vmov 0  }
  0x65   :  { %v1046_v5 = vrot.slane %v227_v0, %v110_v47  ;;  %v241_v6 = vrot.slane %v213_v1, %v203_v50  ;;  %v243_v10 = vcombine.high %v227_v0, %v227_v0  ;;  %860 = vset.pattern.permute.xlu0 %v965_v62  ;;  %861 = vset.pattern.permute.xlu1 %v965_v62 }
  0x66   :  { %v1049_v9 = vrot.slane %v244_v4, %v110_v47 }
  0x67   :  { %v1051_v11 = vrot.slane %v241_v6, %v110_v47  ;;  %v1053_v12 = vrot.slane %v243_v10, %v110_v47  ;;  %v245_v15 = vcombine.high %v241_v6, %v241_v6 }
  0x68   :  { %135 = vbcast.lane.b32.xlu0 %v133_v59, 256  ;;  %139 = vbcast.lane.b32.xlu1 %v133_v59, 264 }
  0x69   :  { %v1056_v16 = vrot.slane %v245_v15, %v110_v47 }
  0x6c   :  { %146 = vbcast.lane.b32.xlu0 %v144_v7, 256  ;;  %150 = vbcast.lane.b32.xlu1 %v144_v7, 264 }
  0x70   :  { %157 = vbcast.lane.b32.xlu0 %v155_v13, 256  ;;  %161 = vbcast.lane.b32.xlu1 %v155_v13, 264 }
  0x74   :  { %168 = vbcast.lane.b32.xlu0 %v166_v17, 256  ;;  %172 = vbcast.lane.b32.xlu1 %v166_v17, 264 }
  0x78   :  { %179 = vbcast.lane.b32.xlu0 %v177_v19, 256  ;;  %183 = vbcast.lane.b32.xlu1 %v177_v19, 264 }
  0x7c   :  { %190 = vbcast.lane.b32.xlu0 %v1060_v21, 256  ;;  %194 = vbcast.lane.b32.xlu1 %v1060_v21, 264 }
  0x80   :  { %463 = vbcast.lane.b32.xlu1 %v111_v51, 256  ;;  %467 = vbcast.lane.b32.xlu0 %v111_v51, 264 }
  0x84   :  { %474 = vbcast.lane.b32.xlu1 %v122_v52, 256  ;;  %485 = vbcast.lane.b32.xlu0 %v133_v59, 256 }
  0x88   :  { %478 = vbcast.lane.b32.xlu1 %v122_v52, 264  ;;  %496 = vbcast.lane.b32.xlu0 %v144_v7, 256 }
  0x8c   :  { %489 = vbcast.lane.b32.xlu1 %v133_v59, 264  ;;  %507 = vbcast.lane.b32.xlu0 %v155_v13, 256 }
  0x90   :  { %500 = vbcast.lane.b32.xlu1 %v144_v7, 264  ;;  %518 = vbcast.lane.b32.xlu0 %v166_v17, 256 }
  0x94   :  { %511 = vbcast.lane.b32.xlu1 %v155_v13, 264  ;;  %529 = vbcast.lane.b32.xlu0 %v177_v19, 256 }
  0x98   :  { %522 = vbcast.lane.b32.xlu1 %v166_v17, 264 }
  0x9c   :  { %533 = vbcast.lane.b32.xlu1 %v177_v19, 264 }
  0xd2   :  { %v114_v25 = vpop.permute.xlu0 %113  ;;  %v125_v26 = vpop.permute.xlu1 %124 }
  0xd3   :  { %vm291_vm10 = vcmp.gt.f32.partialorder %v1040_v61, %v114_v25  ;;  %vm307_vm11 = vcmp.eq.f32.partialorder %v1040_v61, %v114_v25  ;;  %vm309_vm12 = vcmp.eq.f32.partialorder %v1042_v2, %v125_v26  ;;  %vm293_vm14 = vcmp.gt.f32.partialorder %v1042_v2, %v125_v26 }
  0xd4   :  { %vm329_vm13 = vmand %vm307_vm11, %vm1069_vm9 }
  0xd5   :  { %vm331_vm15 = vmand %vm309_vm12, %vm1069_vm9 }
  0xd6   :  { %v118_v28 = vpop.permute.xlu0 %117  ;;  %vm345_vm2 = vmor %vm291_vm10, %vm329_vm13  ;;  %v129_v29 = vpop.permute.xlu1 %128 }
  0xd7   :  { %vm292_vm3 = vcmp.gt.f32.partialorder %v1040_v61, %v118_v28  ;;  %vm308_vm4 = vcmp.eq.f32.partialorder %v1040_v61, %v118_v28  ;;  %v819_v31 = vsel %vm345_vm2, 1.0, %v964_v30  ;;  %vm347_vm5 = vmor %vm293_vm14, %vm331_vm15  ;;  %vm294_vm7 = vcmp.gt.f32.partialorder %v1042_v2, %v129_v29 }
  0xd8   :  { %vm330_vm6 = vmand %vm308_vm4, %vm1083_vm0  ;;  %v394_v32 = vsel %vm393_vm1, %v819_v31, 0.0  ;;  %vm310_vm8 = vcmp.eq.f32.partialorder %v1042_v2, %v129_v29  ;;  %v821_v33 = vsel %vm347_vm5, 1.0, %v964_v30 }
  0xd9   :  { %395 = vadd.xlane.f32.xlu0 %v394_v32  ;;  %vm332_vm10 = vmand %vm310_vm8, %vm1083_vm0  ;;  %v400_v35 = vsel %vm393_vm1, %v821_v33, 0.0 }
  0xda   :  { %v136_v34 = vpop.permute.xlu0 %135  ;;  %vm346_vm11 = vmor %vm292_vm3, %vm330_vm6  ;;  %v140_v36 = vpop.permute.xlu1 %139 }
  0xdb   :  { %vm295_vm12 = vcmp.gt.f32.partialorder %v1044_v3, %v136_v34  ;;  %vm311_vm13 = vcmp.eq.f32.partialorder %v1044_v3, %v136_v34  ;;  %v820_v37 = vsel %vm346_vm11, 1.0, %v964_v30  ;;  %vm348_vm14 = vmor %vm294_vm7, %vm332_vm10  ;;  %vm296_vm2 = vcmp.gt.f32.partialorder %v1044_v3, %v140_v36 }
  0xdc   :  { %vm333_vm15 = vmand %vm311_vm13, %vm1069_vm9  ;;  %v397_v38 = vsel %vm393_vm1, %v820_v37, 0.0  ;;  %vm312_vm4 = vcmp.eq.f32.partialorder %v1044_v3, %v140_v36  ;;  %v822_v39 = vsel %vm348_vm14, 1.0, %v964_v30 }
  0xdd   :  { %401 = vadd.xlane.f32.xlu0 %v400_v35  ;;  %398 = vadd.xlane.f32.xlu1 %v397_v38  ;;  %vm334_vm3 = vmand %vm312_vm4, %vm1083_vm0  ;;  %v403_v42 = vsel %vm393_vm1, %v822_v39, 0.0 }
  0xde   :  { %v147_v40 = vpop.permute.xlu0 %146  ;;  %vm349_vm5 = vmor %vm295_vm12, %vm333_vm15  ;;  %v151_v43 = vpop.permute.xlu1 %150 }
  0xdf   :  { %vm297_vm6 = vcmp.gt.f32.partialorder %v1049_v9, %v147_v40  ;;  %vm313_vm7 = vcmp.eq.f32.partialorder %v1049_v9, %v147_v40  ;;  %v823_v44 = vsel %vm349_vm5, 1.0, %v964_v30  ;;  %vm350_vm8 = vmor %vm296_vm2, %vm334_vm3  ;;  %vm298_vm11 = vcmp.gt.f32.partialorder %v1049_v9, %v151_v43 }
  0xe0   :  { %vm335_vm10 = vmand %vm313_vm7, %vm1069_vm9  ;;  %v406_v45 = vsel %vm393_vm1, %v823_v44, 0.0  ;;  %vm314_vm13 = vcmp.eq.f32.partialorder %v1049_v9, %v151_v43  ;;  %v824_v46 = vsel %vm350_vm8, 1.0, %v964_v30 }
  0xe1   :  { %404 = vadd.xlane.f32.xlu0 %v403_v42  ;;  %407 = vadd.xlane.f32.xlu1 %v406_v45  ;;  %vm336_vm12 = vmand %vm314_vm13, %vm1083_vm0  ;;  %v409_v48 = vsel %vm393_vm1, %v824_v46, 0.0 }
  0xe2   :  { %v158_v47 = vpop.permute.xlu0 %157  ;;  %vm351_vm14 = vmor %vm297_vm6, %vm335_vm10  ;;  %v162_v49 = vpop.permute.xlu1 %161 }
  0xe3   :  { %vm299_vm15 = vcmp.gt.f32.partialorder %v1046_v5, %v158_v47  ;;  %vm315_vm2 = vcmp.eq.f32.partialorder %v1046_v5, %v158_v47  ;;  %v825_v50 = vsel %vm351_vm14, 1.0, %v964_v30  ;;  %vm352_vm4 = vmor %vm298_vm11, %vm336_vm12  ;;  %vm300_vm5 = vcmp.gt.f32.partialorder %v1046_v5, %v162_v49 }
  0xe4   :  { %vm337_vm3 = vmand %vm315_vm2, %vm1069_vm9  ;;  %v412_v51 = vsel %vm393_vm1, %v825_v50, 0.0  ;;  %vm316_vm7 = vcmp.eq.f32.partialorder %v1046_v5, %v162_v49  ;;  %v826_v52 = vsel %vm352_vm4, 1.0, %v964_v30 }
  0xe5   :  { %410 = vadd.xlane.f32.xlu0 %v409_v48  ;;  %413 = vadd.xlane.f32.xlu1 %v412_v51  ;;  %vm338_vm6 = vmand %vm316_vm7, %vm1083_vm0  ;;  %v415_v54 = vsel %vm393_vm1, %v826_v52, 0.0 }
  0xe6   :  { %v169_v53 = vpop.permute.xlu0 %168  ;;  %vm353_vm8 = vmor %vm299_vm15, %vm337_vm3  ;;  %v173_v55 = vpop.permute.xlu1 %172 }
  0xe7   :  { %vm301_vm10 = vcmp.gt.f32.partialorder %v1051_v11, %v169_v53  ;;  %vm317_vm11 = vcmp.eq.f32.partialorder %v1051_v11, %v169_v53  ;;  %v827_v56 = vsel %vm353_vm8, 1.0, %v964_v30  ;;  %vm302_vm13 = vcmp.gt.f32.partialorder %v1051_v11, %v173_v55  ;;  %vm354_vm12 = vmor %vm300_vm5, %vm338_vm6 }
  0xe8   :  { %vm339_vm14 = vmand %vm317_vm11, %vm1069_vm9  ;;  %v418_v57 = vsel %vm393_vm1, %v827_v56, 0.0  ;;  %vm318_vm2 = vcmp.eq.f32.partialorder %v1051_v11, %v173_v55  ;;  %v828_v58 = vsel %vm354_vm12, 1.0, %v964_v30 }
  0xe9   :  { %416 = vadd.xlane.f32.xlu0 %v415_v54  ;;  %419 = vadd.xlane.f32.xlu1 %v418_v57  ;;  %vm340_vm15 = vmand %vm318_vm2, %vm1083_vm0  ;;  %v421_v60 = vsel %vm393_vm1, %v828_v58, 0.0 }
  0xea   :  { %v180_v59 = vpop.permute.xlu0 %179  ;;  %vm355_vm4 = vmor %vm301_vm10, %vm339_vm14  ;;  %v184_v61 = vpop.permute.xlu1 %183 }
  0xeb   :  { %vm303_vm3 = vcmp.gt.f32.partialorder %v1053_v12, %v180_v59  ;;  %vm319_vm5 = vcmp.eq.f32.partialorder %v1053_v12, %v180_v59  ;;  %v829_v63 = vsel %vm355_vm4, 1.0, %v964_v30  ;;  %vm356_vm7 = vmor %vm302_vm13, %vm340_vm15  ;;  %vm304_vm8 = vcmp.gt.f32.partialorder %v1053_v12, %v184_v61 }
  0xec   :  { %vm341_vm6 = vmand %vm319_vm5, %vm1069_vm9  ;;  %v424_v0 = vsel %vm393_vm1, %v829_v63, 0.0  ;;  %vm320_vm10 = vcmp.eq.f32.partialorder %v1053_v12, %v184_v61  ;;  %v830_v1 = vsel %vm356_vm7, 1.0, %v964_v30  ;;  %v55_v63 = vld [vmem:[#allocation7] sm:$0xff] }
  0xed   :  { %422 = vadd.xlane.f32.xlu0 %v421_v60  ;;  %425 = vadd.xlane.f32.xlu1 %v424_v0  ;;  %vm342_vm11 = vmand %vm320_vm10, %vm1083_vm0  ;;  %v427_v3 = vsel %vm393_vm1, %v830_v1, 0.0  ;;  %v56_v0 = vld [vmem:[#allocation7 + $0x8] sm:$0xff] }
  0xee   :  { %v191_v2 = vpop.permute.xlu0 %190  ;;  %vm357_vm13 = vmor %vm303_vm3, %vm341_vm6  ;;  %v195_v4 = vpop.permute.xlu1 %194 }
  0xef   :  { %vm305_vm12 = vcmp.gt.f32.partialorder %v1056_v16, %v191_v2  ;;  %vm321_vm14 = vcmp.eq.f32.partialorder %v1056_v16, %v191_v2  ;;  %v831_v5 = vsel %vm357_vm13, 1.0, %v964_v30  ;;  %vm358_vm2 = vmor %vm304_vm8, %vm342_vm11  ;;  %vm306_vm4 = vcmp.gt.f32.partialorder %v1056_v16, %v195_v4 }
  0xf0   :  { %vm343_vm15 = vmand %vm321_vm14, %vm1069_vm9  ;;  %v430_v6 = vsel %vm393_vm1, %v831_v5, 0.0  ;;  %vm322_vm5 = vcmp.eq.f32.partialorder %v1056_v16, %v195_v4  ;;  %v832_v7 = vsel %vm358_vm2, 1.0, %v964_v30  ;;  %v847_v2 = vpack.c.bf16 %v56_v0, %v55_v63 }
  0xf1   :  { %428 = vadd.xlane.f32.xlu0 %v427_v3  ;;  %431 = vadd.xlane.f32.xlu1 %v430_v6  ;;  %vm344_vm3 = vmand %vm322_vm5, %vm1083_vm0  ;;  %v433_v8 = vsel %vm393_vm1, %v832_v7, 0.0  ;;  %v966_v3 = vmov 0.0|0.0  }
  0xf2   :  { %vm359_vm7 = vmor %vm305_vm12, %vm343_vm15  ;;  %v464_v13 = vpop.permute.xlu1 %463  ;;  %v468_v15 = vpop.permute.xlu0 %467  ;;  %846 = vmatprep.subr.bf16.mxu0 %v966_v3 }
  0xf3   :  { %v833_v9 = vsel %vm359_vm7, 1.0, %v964_v30  ;;  %vm360_vm6 = vmor %vm306_vm4, %vm344_vm3  ;;  %848 = vmatpush3.bf16.msra.mxu0 %v847_v2 }
  0xf4   :  { %v436_v10 = vsel %vm393_vm1, %v833_v9, 0.0  ;;  %v834_v11 = vsel %vm360_vm6, 1.0, %v964_v30 }
  0xf5   :  { %434 = vadd.xlane.f32.xlu0 %v433_v8  ;;  %437 = vadd.xlane.f32.xlu1 %v436_v10  ;;  %v439_v12 = vsel %vm393_vm1, %v834_v11, 0.0 }
  0xf6   :  { %v475_v14 = vpop.permute.xlu1 %474  ;;  %v486_v17 = vpop.permute.xlu0 %485 }
  0xf9   :  { %440 = vadd.xlane.f32.xlu0 %v439_v12  ;;  %v646_v12 = vadd.s32 4294967288, %v1065_v22 }
  0xfa   :  { %v479_v16 = vpop.permute.xlu1 %478  ;;  %v497_v19 = vpop.permute.xlu0 %496 }
  0xfe   :  { %v490_v18 = vpop.permute.xlu1 %489  ;;  %v508_v23 = vpop.permute.xlu0 %507 }
 0x102   :  { %v501_v20 = vpop.permute.xlu1 %500  ;;  %v519_v25 = vpop.permute.xlu0 %518 }
 0x106   :  { %544 = vbcast.lane.b32.xlu1 %v1060_v21, 264  ;;  %v512_v24 = vpop.permute.xlu1 %511  ;;  %v530_v27 = vpop.permute.xlu0 %529 }
 0x10a   :  { %v523_v26 = vpop.permute.xlu1 %522 }
 0x10e   :  { %v534_v28 = vpop.permute.xlu1 %533 }
 0x10f   :  { %540 = vbcast.lane.b32.xlu0 %v1060_v21, 256 }
 0x166   :  { %v396_v29 = vpop.xlane.xlu0 %395 }
 0x167   :  { %vm442_vm9 = vcmp.lt.f32.partialorder %v396_v29, 12.0 }
 0x168   :  { %v562_v31 = vsel %vm442_vm9, %v464_v13, 0.0 }
 0x169   :  { %595 = vperm.xlu0 %860, %v562_v31  }
 0x16a   :  { %v399_v32 = vpop.xlane.xlu1 %398  ;;  %v402_v21 = vpop.xlane.xlu0 %401 }
 0x16b   :  { %vm443_vm0 = vcmp.lt.f32.partialorder %v399_v32, 12.0  ;;  %vm444_vm8 = vcmp.lt.f32.partialorder %v402_v21, 12.0 }
 0x16c   :  { %v563_v33 = vsel %vm443_vm0, %v468_v15, 0.0  ;;  %v564_v36 = vsel %vm444_vm8, %v475_v14, 0.0  ;;  %vm967_vm0 = vmmov 0   ;;  %v644_v15 = vsub.s32 %v1065_v22, %v1033_v41 }
 0x16d   :  { %598 = vperm.xlu1 %861, %v563_v33   ;;  %843 = vmatprep.mubr.msk.f32.mxu0 %vm967_vm0, %v964_v30  ;;  %vm651_vm8 = vcmask 130112  }
 0x16e   :  { %v408_v34 = vpop.xlane.xlu1 %407  ;;  %v405_v35 = vpop.xlane.xlu0 %404 }
 0x16f   :  { %vm445_vm10 = vcmp.lt.f32.partialorder %v405_v35, 12.0  ;;  %vm446_vm11 = vcmp.lt.f32.partialorder %v408_v34, 12.0 }
 0x170   :  { %v565_v37 = vsel %vm445_vm10, %v479_v16, 0.0  ;;  %v566_v40 = vsel %vm446_vm11, %v486_v17, 0.0  ;;  %v649_v16 = vsub.s32 %v646_v12, %v1033_v41  ;;  %vm716_vm10 = vcmask 1041409  }
 0x171   :  { %601 = vperm.xlu1 %861, %v564_v36   ;;  %604 = vperm.xlu0 %860, %v565_v37   ;;  %vm718_vm11 = vcmask 1042434  }
 0x172   :  { %v414_v38 = vpop.xlane.xlu1 %413  ;;  %v411_v39 = vpop.xlane.xlu0 %410 }
 0x173   :  { %vm447_vm13 = vcmp.lt.f32.partialorder %v411_v39, 12.0  ;;  %vm448_vm12 = vcmp.lt.f32.partialorder %v414_v38, 12.0 }
 0x174   :  { %v567_v42 = vsel %vm447_vm13, %v490_v18, 0.0  ;;  %v568_v45 = vsel %vm448_vm12, %v497_v19, 0.0  ;;  %vm720_vm13 = vcmask 1043459   ;;  %vm722_vm12 = vcmask 1044484  }
 0x175   :  { %607 = vperm.xlu1 %861, %v566_v40   ;;  %610 = vperm.xlu0 %860, %v567_v42  }
 0x176   :  { %v420_v43 = vpop.xlane.xlu1 %419  ;;  %v417_v44 = vpop.xlane.xlu0 %416 }
 0x177   :  { %vm449_vm14 = vcmp.lt.f32.partialorder %v417_v44, 12.0  ;;  %vm450_vm2 = vcmp.lt.f32.partialorder %v420_v43, 12.0 }
 0x178   :  { %v569_v46 = vsel %vm449_vm14, %v501_v20, 0.0  ;;  %v570_v49 = vsel %vm450_vm2, %v508_v23, 0.0  ;;  %vm724_vm14 = vcmask 1045509   ;;  %vm726_vm2 = vcmask 1046534  }
 0x179   :  { %613 = vperm.xlu1 %861, %v568_v45   ;;  %616 = vperm.xlu0 %860, %v569_v46  }
 0x17a   :  { %v426_v47 = vpop.xlane.xlu1 %425  ;;  %v423_v48 = vpop.xlane.xlu0 %422 }
 0x17b   :  { %vm451_vm15 = vcmp.lt.f32.partialorder %v423_v48, 12.0  ;;  %vm452_vm4 = vcmp.lt.f32.partialorder %v426_v47, 12.0 }
 0x17c   :  { %v571_v50 = vsel %vm451_vm15, %v512_v24, 0.0  ;;  %v572_v53 = vsel %vm452_vm4, %v519_v25, 0.0  ;;  %vm728_vm15 = vcmask 1047559  }
 0x17d   :  { %619 = vperm.xlu1 %861, %v570_v49   ;;  %622 = vperm.xlu0 %860, %v571_v50  }
 0x17e   :  { %v432_v51 = vpop.xlane.xlu1 %431  ;;  %v429_v52 = vpop.xlane.xlu0 %428 }
 0x17f   :  { %vm453_vm5 = vcmp.lt.f32.partialorder %v429_v52, 12.0  ;;  %vm454_vm3 = vcmp.lt.f32.partialorder %v432_v51, 12.0 }
 0x180   :  { %v573_v54 = vsel %vm453_vm5, %v523_v26, 0.0  ;;  %v574_v57 = vsel %vm454_vm3, %v530_v27, 0.0 }
 0x181   :  { %625 = vperm.xlu1 %861, %v572_v53   ;;  %628 = vperm.xlu0 %860, %v573_v54  }
 0x182   :  { %v435_v55 = vpop.xlane.xlu0 %434  ;;  %v438_v56 = vpop.xlane.xlu1 %437 }
 0x183   :  { %vm455_vm7 = vcmp.lt.f32.partialorder %v435_v55, 12.0  ;;  %vm456_vm9 = vcmp.lt.f32.partialorder %v438_v56, 12.0 }
 0x184   :  { %v575_v58 = vsel %vm455_vm7, %v534_v28, 0.0 }
 0x185   :  { %631 = vperm.xlu1 %861, %v574_v57   ;;  %634 = vperm.xlu0 %860, %v575_v58  }
 0x186   :  { %v441_v59 = vpop.xlane.xlu0 %440  ;;  %v545_v60 = vpop.permute.xlu1 %544 }
 0x187   :  { %vm457_vm6 = vcmp.lt.f32.partialorder %v441_v59, 12.0 }
 0x188   :  { %v577_v61 = vsel %vm457_vm6, %v545_v60, 0.0 }
 0x189   :  { %640 = vperm.xlu0 %860, %v577_v61  }
 0x18a   :  { %v541_v62 = vpop.permute.xlu0 %540 }
 0x18b   :  { %v576_v1 = vsel %vm456_vm9, %v541_v62, 0.0 }
 0x18c   :  { %637 = vperm.xlu1 %861, %v576_v1  }
 0x1e8   :  { %v596_v4 = vpop.permute.xlu0 %595 }
 0x1e9   :  { %v645_v32 = vrot.slane %v596_v4, %v644_v15 }
 0x1ec   :  { %v599_v5 = vpop.permute.xlu1 %598 }
 0x1ed   :  { %v650_v24 = vrot.slane %v599_v5, %v649_v16 }
 0x1ef   :  { %v652_v36 = vsel %vm651_vm8, %v650_v24, %v645_v32 }
 0x1f0   :  { %v602_v6 = vpop.permute.xlu1 %601  ;;  %v605_v7 = vpop.permute.xlu0 %604 }
 0x1f1   :  { %v656_v30 = vrot.slane %v602_v6, %v644_v15  ;;  %v660_v19 = vrot.slane %v605_v7, %v649_v16 }
 0x1f3   :  { %v661_v22 = vsel %vm651_vm8, %v660_v19, %v656_v30 }
 0x1f4   :  { %v608_v8 = vpop.permute.xlu1 %607  ;;  %v611_v9 = vpop.permute.xlu0 %610  ;;  %v717_v38 = vsel %vm716_vm10, %v661_v22, %v652_v36 }
 0x1f5   :  { %v665_v20 = vrot.slane %v608_v8, %v644_v15  ;;  %v669_v23 = vrot.slane %v611_v9, %v649_v16 }
 0x1f7   :  { %v670_v33 = vsel %vm651_vm8, %v669_v23, %v665_v20 }
 0x1f8   :  { %v614_v10 = vpop.permute.xlu1 %613  ;;  %v617_v11 = vpop.permute.xlu0 %616  ;;  %v719_v42 = vsel %vm718_vm11, %v670_v33, %v717_v38 }
 0x1f9   :  { %v674_v25 = vrot.slane %v614_v10, %v644_v15  ;;  %v678_v26 = vrot.slane %v617_v11, %v649_v16 }
 0x1fb   :  { %v679_v37 = vsel %vm651_vm8, %v678_v26, %v674_v25 }
 0x1fc   :  { %v620_v13 = vpop.permute.xlu1 %619  ;;  %v623_v14 = vpop.permute.xlu0 %622  ;;  %v721_v44 = vsel %vm720_vm13, %v679_v37, %v719_v42 }
 0x1fd   :  { %v683_v29 = vrot.slane %v620_v13, %v644_v15  ;;  %v687_v31 = vrot.slane %v623_v14, %v649_v16 }
 0x1ff   :  { %v688_v39 = vsel %vm651_vm8, %v687_v31, %v683_v29 }
 0x200   :  { %v626_v17 = vpop.permute.xlu1 %625  ;;  %v629_v18 = vpop.permute.xlu0 %628  ;;  %v723_v47 = vsel %vm722_vm12, %v688_v39, %v721_v44 }
 0x201   :  { %v692_v21 = vrot.slane %v626_v17, %v644_v15  ;;  %v696_v41 = vrot.slane %v629_v18, %v649_v16 }
 0x203   :  { %v697_v43 = vsel %vm651_vm8, %v696_v41, %v692_v21 }
 0x204   :  { %v632_v27 = vpop.permute.xlu1 %631  ;;  %v635_v28 = vpop.permute.xlu0 %634  ;;  %v725_v50 = vsel %vm724_vm14, %v697_v43, %v723_v47 }
 0x205   :  { %v701_v34 = vrot.slane %v632_v27, %v644_v15  ;;  %v705_v35 = vrot.slane %v635_v28, %v649_v16 }
 0x207   :  { %v706_v45 = vsel %vm651_vm8, %v705_v35, %v701_v34 }
 0x208   :  { %v641_v40 = vpop.permute.xlu0 %640  ;;  %v727_v52 = vsel %vm726_vm2, %v706_v45, %v725_v50 }
 0x209   :  { %v714_v48 = vrot.slane %v641_v40, %v649_v16 }
 0x20b   :  { %v638_v46 = vpop.permute.xlu1 %637 }
 0x20c   :  { %v710_v49 = vrot.slane %v638_v46, %v644_v15 }
 0x20e   :  { %v715_v51 = vsel %vm651_vm8, %v714_v48, %v710_v49 }
 0x20f   :  { %v729_v53 = vsel %vm728_vm15, %v715_v51, %v727_v52 }
 0x210   :  { %844 = vmatmul.mubr.msk.f32.vlgmr.msra.gmra.mrb[0].mxu0 %vm393_vm1, %v729_v53 }
 0x2e3   :  { %v798_v54 = vpop.f32.mrb[0].mxu0 }
 0x2e4   :  { %802 = vst [vmem:[#allocation8] sm:$0xff] %v798_v54  ;;  %v845_v55 = vpop.f32.mrb[1].mxu0 }
 0x2e5   :  { %941 = shalt.err (!%p938_p0)
}
 0x2e6   :  { %s942_s25 = scalar_lea.hbm %s1208_s3, 128 }
 0x2e7   :  { %p943_p1 = scmp.ne.s32.totalorder %s1208_s3, %s942_s25  ;;  %p946_p2 = scmp.lt.u32.totalorder %s942_s25, %s1208_s3 }
 0x2e9   :  { %p948_p3 = pnand %p946_p2, %p943_p1 }
 0x2eb   :  { %951 = shalt.err (!%p948_p3)
}
 0x2ec   :  { %812 = dma.vmem_to_hbm [thread:$0]  %s810_s21, 128, %s1208_s3, [#allocation4]  }
 0x2ed   :  { %956 = dma.done.wait [#allocation4], 128  }
 0x2ee   :  { %957 = vsyncadd [#allocation4], 4294967168 }
 0x2ef   :  { %816 = vsyncpa [#allocation3], 1 }
 0x2f0   :  { %817 = vsyncpa [#allocation6], 1 }
 0x2f1   :  { %818 = vsyncpa [#allocation4], 1 }

</bundles_post_ra>
